<compile_context>
chip_gen: v7x
topology: tpu7x:2x2x1
jax: 0.10.0
libtpu: 0.0.40
codegen_flags: <defaults>
</compile_context>

<pallas_src>
import functools

import numpy as np
import jax
import jax.numpy as jnp
from jax.experimental import pallas as pl
from jax.experimental.pallas import tpu as pltpu

_BF16 = jnp.bfloat16


def _tpu_vmem_capacity():
    try:
        return int(pltpu.get_tpu_info().vmem_capacity_bytes)
    except Exception:
        return 64 << 20              # conservative (v7x-sized) fallback


_VMEM_CAP = _tpu_vmem_capacity()
# Explicit scoped-VMEM limit for every pallas_call (defaults: 16/32 MiB).
_VMEM_LIMIT = int(min(_VMEM_CAP * 3 // 4, 100 << 20))


def _cparams(*sem):
    return pltpu.CompilerParams(dimension_semantics=sem,
                                vmem_limit_bytes=_VMEM_LIMIT)


def _row_tile(n, target=512):
    """Largest row tile <= target that divides n and is a multiple of 8."""
    t = min(target, n)
    for cand in range(t, 7, -1):
        if cand % 8 == 0 and n % cand == 0:
            return cand
    # TODO(synk): pad + mask a ragged last tile instead of a full-array block
    # when n has no multiple-of-8 divisor <= target.
    return n


def _attn_l2_tile(L):
    """Generation-aware L2 column tile for the attention kernel."""
    if _VMEM_CAP >= (96 << 20):      # v5e / v6e: 128 MiB physical VMEM
        target = 128
    elif _VMEM_CAP >= (48 << 20):    # v7x: 64 MiB (bf16 e_o keeps this safe)
        target = 64
    else:
        target = 32
    return _row_tile(L, target=target)


# ----------------------------- Pallas kernels ------------------------------

def _qkv_kernel(x_ref, w_ref, o_ref):
    # fused QKV projection (no bias): (TM, D) @ (D, 3D), weights pre-cast bf16
    o_ref[...] = jnp.dot(x_ref[...].astype(_BF16), w_ref[...],
                         preferred_element_type=jnp.float32)


def _attn_kernel(q_ref, k_ref, v_ref, e_ref, we_ref, woe_ref, boe_ref,
                 hsel_ref, h_ref, eo_ref, est_ref, *, num_heads, scale):
    """One (batch, L2-tile) step: proj_e + score + O_e(+res, bf16 store)
    + BN stats + per-head softmax(L1) + partial attn @ V (accumulated over
    the arbitrary L2 grid axis)."""
    l2 = pl.program_id(1)
    L1, D = q_ref.shape[1], q_ref.shape[2]
    TL2 = k_ref.shape[1]
    C = D // num_heads

    q = q_ref[0] * scale              # fold 1/sqrt(C) into q (L1*D op)
    k = k_ref[0]                      # (TL2, D)
    v_bf = v_ref[0].astype(_BF16)     # (TL2, D)
    e_blk = e_ref[0]                  # (L1, TL2, D) f32
    e2d = e_blk.reshape(L1 * TL2, D)

    # fused proj_e on the MXU (weights pre-cast bf16)
    pe = jnp.dot(e2d.astype(_BF16), we_ref[...],
                 preferred_element_type=jnp.float32)          # (L1*TL2, D)

    # single fused f32 score intermediate, cast to bf16 once and reused
    score3 = (q[:, None, :] * k[None, :, :]) * pe.reshape(L1, TL2, D)
    score_bf = score3.reshape(L1 * TL2, D).astype(_BF16)

    # e path: O_e + bias + residual; stats from f32, lane-dense bf16 store
    eo = jnp.dot(score_bf, woe_ref[...], preferred_element_type=jnp.float32)
    eo = eo + boe_ref[...] + e2d                              # (L1*TL2, D)
    est_ref[...] = jnp.concatenate(
        [jnp.sum(eo, axis=0, keepdims=True),
         jnp.sum(eo * eo, axis=0, keepdims=True)], axis=0)[None, None]
    eo_ref[0] = eo.reshape(L1, TL2, D).astype(eo_ref.dtype)

    # per-head score via ONE MXU matmul against the 0/1 head selector (D, H)
    s = jnp.dot(score_bf, hsel_ref[...], preferred_element_type=jnp.float32)
    s = jnp.clip(s.reshape(L1, TL2, num_heads), -5.0, 5.0)
    mx = jnp.max(s, axis=0, keepdims=True)                    # softmax over L1
    p = jnp.exp(s - mx)
    attn = p * pl.reciprocal(jnp.sum(p, axis=0, keepdims=True), approx=True)

    @pl.when(l2 == 0)
    def _():
        h_ref[...] = jnp.zeros_like(h_ref)

    # attn @ V per head (masked full-D V keeps matmuls lane dense; fine for
    # D <= 128 — slice/batch heads instead if D grows beyond one MXU tile).
    head_of = jax.lax.broadcasted_iota(jnp.int32, (1, D), 1) // C
    h_acc = jnp.zeros((L1, D), jnp.float32)
    for hd in range(num_heads):
        vm = jnp.where(head_of == hd, v_bf, jnp.zeros_like(v_bf))
        a = attn[:, :, hd].astype(_BF16)                      # (L1, TL2)
        h_acc = h_acc + jnp.dot(a, vm, preferred_element_type=jnp.float32)
    h_ref[0] = h_ref[0] + h_acc


def _linear_res_stats_kernel(x_ref, w_ref, b_ref, r_ref, o_ref, st_ref):
    # y = x @ w + b + residual ; also emit per-tile BN statistics of y
    y = jnp.dot(x_ref[...].astype(_BF16), w_ref[...],
                preferred_element_type=jnp.float32)
    y = y + b_ref[...] + r_ref[...]
    o_ref[...] = y
    st_ref[...] = jnp.concatenate(
        [jnp.sum(y, axis=0, keepdims=True),
         jnp.sum(y * y, axis=0, keepdims=True)], axis=0)[None]


def _ffn_kernel(x_ref, sc_ref, sh_ref, w1_ref, b1_ref, w2_ref, b2_ref,
                o_ref, st_ref):
    # prologue: apply previous BatchNorm as per-channel affine (f32)
    xn = x_ref[...].astype(jnp.float32) * sc_ref[...] + sh_ref[...]
    # fused FFN: relu(xn @ W1 + b1) @ W2 + b2 + xn
    t = jnp.dot(xn.astype(_BF16), w1_ref[...],
                preferred_element_type=jnp.float32) + b1_ref[...]
    t = jnp.maximum(t, 0.0)
    y = jnp.dot(t.astype(_BF16), w2_ref[...],
                preferred_element_type=jnp.float32) + b2_ref[...] + xn
    # epilogue: per-tile BN statistics (from f32) for the following BatchNorm
    st_ref[...] = jnp.concatenate(
        [jnp.sum(y, axis=0, keepdims=True),
         jnp.sum(y * y, axis=0, keepdims=True)], axis=0)[None]
    o_ref[...] = y.astype(o_ref.dtype)


def _affine_kernel(x_ref, sc_ref, sh_ref, o_ref):
    # final BatchNorm applied as per-channel affine (bf16 or f32 input)
    o_ref[...] = (x_ref[...].astype(jnp.float32) * sc_ref[...]
                  + sh_ref[...]).astype(o_ref.dtype)


# ------------------------------ kernel wrappers -----------------------------

def qkv_proj(x2d, wqkv_bf):
    n, d = x2d.shape
    d3 = wqkv_bf.shape[1]
    tm = _row_tile(n, target=1024)
    return pl.pallas_call(
        _qkv_kernel,
        grid=(n // tm,),
        in_specs=[pl.BlockSpec((tm, d), lambda i: (i, 0)),
                  pl.BlockSpec((d, d3), lambda i: (0, 0))],
        out_specs=pl.BlockSpec((tm, d3), lambda i: (i, 0)),
        out_shape=jax.ShapeDtypeStruct((n, d3), jnp.float32),
        compiler_params=_cparams("parallel"),
    )(x2d, wqkv_bf)


def attention(q, k, v, e, we_bf, woe_bf, boe, num_heads, scale):
    B, L, D = q.shape
    C = D // num_heads
    tl2 = _attn_l2_tile(L)
    nl2 = L // tl2
    # static 0/1 head selector: column h sums head h's contiguous C channels
    hsel = jnp.asarray(
        (np.arange(D)[:, None] // C) == np.arange(num_heads)[None, :],
        dtype=_BF16)
    kern = functools.partial(_attn_kernel, num_heads=num_heads, scale=scale)
    # NOTE(v7x): B is the only "parallel" axis here; with B == 1 one of the
    # two TensorCores idles — tile L1 with an online softmax if that matters.
    h_att, e_o, e_stats = pl.pallas_call(
        kern,
        grid=(B, nl2),
        in_specs=[
            pl.BlockSpec((1, L, D), lambda b, j: (b, 0, 0)),          # q (full L1)
            pl.BlockSpec((1, tl2, D), lambda b, j: (b, j, 0)),        # k slice
            pl.BlockSpec((1, tl2, D), lambda b, j: (b, j, 0)),        # v slice
            pl.BlockSpec((1, L, tl2, D), lambda b, j: (b, 0, j, 0)),  # e block
            pl.BlockSpec((D, D), lambda b, j: (0, 0)),                # We (bf16)
            pl.BlockSpec((D, D), lambda b, j: (0, 0)),                # WOe (bf16)
            pl.BlockSpec((1, D), lambda b, j: (0, 0)),                # bOe
            pl.BlockSpec((D, num_heads), lambda b, j: (0, 0)),        # head sel
        ],
        out_specs=[
            pl.BlockSpec((1, L, D), lambda b, j: (b, 0, 0)),          # h (accum)
            pl.BlockSpec((1, L, tl2, D), lambda b, j: (b, 0, j, 0)),  # e out bf16
            pl.BlockSpec((1, 1, 2, D), lambda b, j: (b, j, 0, 0)),    # BN stats
        ],
        out_shape=[
            jax.ShapeDtypeStruct((B, L, D), jnp.float32),
            jax.ShapeDtypeStruct((B, L, L, D), _BF16),
            jax.ShapeDtypeStruct((B, nl2, 2, D), jnp.float32),
        ],
        compiler_params=_cparams("parallel", "arbitrary"),
    )(q, k, v, e, we_bf, woe_bf, boe.reshape(1, D), hsel)
    return h_att, e_o, e_stats


def linear_res_stats(x2d, w_bf, b, r2d):
    n, d = x2d.shape
    dout = w_bf.shape[1]
    tm = _row_tile(n, target=1024)
    nt = n // tm
    y, st = pl.pallas_call(
        _linear_res_stats_kernel,
        grid=(nt,),
        in_specs=[pl.BlockSpec((tm, d), lambda i: (i, 0)),
                  pl.BlockSpec((d, dout), lambda i: (0, 0)),
                  pl.BlockSpec((1, dout), lambda i: (0, 0)),
                  pl.BlockSpec((tm, dout), lambda i: (i, 0))],
        out_specs=[pl.BlockSpec((tm, dout), lambda i: (i, 0)),
                   pl.BlockSpec((1, 2, dout), lambda i: (i, 0, 0))],
        out_shape=[jax.ShapeDtypeStruct((n, dout), jnp.float32),
                   jax.ShapeDtypeStruct((nt, 2, dout), jnp.float32)],
        compiler_params=_cparams("parallel"),
    )(x2d, w_bf, b.reshape(1, dout), r2d)
    return y, st


def ffn(x2d, scale1, shift1, w1_bf, b1, w2_bf, b2, out_dtype):
    n, d = x2d.shape
    dh = w1_bf.shape[1]
    tm = _row_tile(n, target=512)   # 2D-wide intermediate -> moderate row tile
    nt = n // tm
    y, st = pl.pallas_call(
        _ffn_kernel,
        grid=(nt,),
        in_specs=[pl.BlockSpec((tm, d), lambda i: (i, 0)),
                  pl.BlockSpec((1, d), lambda i: (0, 0)),
                  pl.BlockSpec((1, d), lambda i: (0, 0)),
                  pl.BlockSpec((d, dh), lambda i: (0, 0)),
                  pl.BlockSpec((1, dh), lambda i: (0, 0)),
                  pl.BlockSpec((dh, d), lambda i: (0, 0)),
                  pl.BlockSpec((1, d), lambda i: (0, 0))],
        out_specs=[pl.BlockSpec((tm, d), lambda i: (i, 0)),
                   pl.BlockSpec((1, 2, d), lambda i: (i, 0, 0))],
        out_shape=[jax.ShapeDtypeStruct((n, d), out_dtype),
                   jax.ShapeDtypeStruct((nt, 2, d), jnp.float32)],
        compiler_params=_cparams("parallel"),
    )(x2d, scale1, shift1, w1_bf, b1.reshape(1, dh), w2_bf, b2.reshape(1, d))
    return y, st


def affine(x2d, scale, shift):
    n, d = x2d.shape
    tm = _row_tile(n, target=1024)
    return pl.pallas_call(
        _affine_kernel,
        grid=(n // tm,),
        in_specs=[pl.BlockSpec((tm, d), lambda i: (i, 0)),
                  pl.BlockSpec((1, d), lambda i: (0, 0)),
                  pl.BlockSpec((1, d), lambda i: (0, 0))],
        out_specs=pl.BlockSpec((tm, d), lambda i: (i, 0)),
        out_shape=jax.ShapeDtypeStruct((n, d), jnp.float32),
        compiler_params=_cparams("parallel"),
    )(x2d, scale, shift)


def _bn_affine(stats, gamma, beta, n, eps=1e-5):
    """Tiny cross-tile reduction of per-tile (sum, sumsq) -> (scale, shift)."""
    s = jnp.sum(stats.reshape(-1, 2, stats.shape[-1]), axis=0)   # (2, D)
    mean = s[0] / n
    var = s[1] / n - mean * mean          # biased variance (torch BN training)
    scale = gamma * jax.lax.rsqrt(var + eps)
    shift = beta - mean * scale
    return scale.reshape(1, -1), shift.reshape(1, -1)


# ------------------------- full layer (Pallas path) -------------------------

def prepare_params(params):
    """One-time: fuse Wq/Wk/Wv and pre-cast matmul weights to bf16."""
    p = dict(params)
    p["Wqkv_bf16"] = jnp.concatenate(
        [params["Wq"], params["Wk"], params["Wv"]], axis=1).astype(_BF16)
    for name in ("We", "WOe", "WOh", "Wf1h", "Wf2h", "Wf1e", "Wf2e"):
        p[name + "_bf16"] = params[name].astype(_BF16)
    return p


def graph_transformer_layer(h, e, params, num_heads):
    B, L, D = h.shape
    C = D // num_heads
    scale = float(1.0 / np.sqrt(C))
    Nh, Ne = B * L, B * L * L

    h2 = h.reshape(Nh, D)

    # fused QKV projection (single read of h, single 3D-wide matmul)
    qkv = qkv_proj(h2, params["Wqkv_bf16"])                    # (B*L, 3D)
    q = qkv[:, 0 * D:1 * D].reshape(B, L, D)
    k = qkv[:, 1 * D:2 * D].reshape(B, L, D)
    v = qkv[:, 2 * D:3 * D].reshape(B, L, D)

    # attention with fused proj_e, O_e + residual (bf16 store) and BN1(e) stats
    h_att, e_o, e_stats = attention(q, k, v, e, params["We_bf16"],
                                    params["WOe_bf16"], params["bOe"],
                                    num_heads, scale)

    # h path: O_h + residual, with BN1(h) statistics in the epilogue
    h_o, h_stats = linear_res_stats(h_att.reshape(Nh, D),
                                    params["WOh_bf16"], params["bOh"], h2)

    sc1h, sh1h = _bn_affine(h_stats, params["g1h"], params["b1h"], Nh)
    sc1e, sh1e = _bn_affine(e_stats, params["g1e"], params["b1e"], Ne)

    # FFN (BN1 applied in prologue, layer1+ReLU+layer2+residual fused,
    # BN2 statistics in epilogue); e path streams bf16 between kernels.
    hf, hf_stats = ffn(h_o, sc1h, sh1h, params["Wf1h_bf16"], params["bf1h"],
                       params["Wf2h_bf16"], params["bf2h"], jnp.float32)
    ef, ef_stats = ffn(e_o.reshape(Ne, D), sc1e, sh1e,
                       params["Wf1e_bf16"], params["bf1e"],
                       params["Wf2e_bf16"], params["bf2e"], _BF16)

    sc2h, sh2h = _bn_affine(hf_stats, params["g2h"], params["b2h"], Nh)
    sc2e, sh2e = _bn_affine(ef_stats, params["g2e"], params["b2e"], Ne)

    h_out = affine(hf, sc2h, sh2h).reshape(B, L, D)
    e_out = affine(ef, sc2e, sh2e).reshape(B, L, L, D)
    return h_out, e_out


# --------------------------- pure-JAX reference ------------------------------

def ref_forward(h, e, params, num_heads):
    B, L, D = h.shape
    C = D // num_heads
    hp = jax.lax.Precision.HIGHEST

    Qh = jnp.matmul(h, params["Wq"], precision=hp)
    Kh = jnp.matmul(h, params["Wk"], precision=hp)
    Vh = jnp.matmul(h, params["Wv"], precision=hp)
    Pe = jnp.matmul(e, params["We"], precision=hp)

    Qh = Qh.reshape(B, L, num_heads, C).transpose(0, 2, 1, 3)
    Kh = Kh.reshape(B, L, num_heads, C).transpose(0, 2, 1, 3)
    Vh = Vh.reshape(B, L, num_heads, C).transpose(0, 2, 1, 3)
    Pe = Pe.reshape(B, L, L, num_heads, C).transpose(0, 3, 1, 2, 4)

    score = Qh[:, :, :, None, :] * Kh[:, :, None, :, :] / np.sqrt(C)
    score = score * Pe
    e_out = score
    s = jnp.clip(score.sum(-1), -5.0, 5.0)
    s = jax.nn.softmax(s, axis=2)
    h_out = jnp.matmul(s, Vh, precision=hp)

    h_out = h_out.transpose(0, 2, 1, 3).reshape(B, L, D)
    e_out = e_out.transpose(0, 2, 3, 1, 4).reshape(B, L, L, D)

    h_ = h + (jnp.matmul(h_out, params["WOh"], precision=hp) + params["bOh"])
    e_ = e + (jnp.matmul(e_out, params["WOe"], precision=hp) + params["bOe"])

    def bn(x, g, b):
        xf = x.reshape(-1, D)
        m = xf.mean(0)
        v = xf.var(0)
        return (((xf - m) / jnp.sqrt(v + 1e-5)) * g + b).reshape(x.shape)

    h_ = bn(h_, params["g1h"], params["b1h"])
    e_ = bn(e_, params["g1e"], params["b1e"])
    hin2, ein2 = h_, e_

    hf = jnp.maximum(jnp.matmul(h_, params["Wf1h"], precision=hp) + params["bf1h"], 0.0)
    hf = jnp.matmul(hf, params["Wf2h"], precision=hp) + params["bf2h"] + hin2
    ef = jnp.maximum(jnp.matmul(e_, params["Wf1e"], precision=hp) + params["bf1e"], 0.0)
    ef = jnp.matmul(ef, params["Wf2e"], precision=hp) + params["bf2e"] + ein2

    hf = bn(hf, params["g2h"], params["b2h"])
    ef = bn(ef, params["g2e"], params["b2e"])
    return hf, ef


# ----------------------------------- main ------------------------------------

def make_params(key, D):
    ks = jax.random.split(key, 24)
    n = lambda k, shp, s=0.1: (s * jax.random.normal(k, shp)).astype(jnp.float32)
    return {
        "Wq": n(ks[0], (D, D)), "Wk": n(ks[1], (D, D)), "Wv": n(ks[2], (D, D)),
        "We": n(ks[3], (D, D)),
        "WOh": n(ks[4], (D, D)), "bOh": n(ks[5], (D,)),
        "WOe": n(ks[6], (D, D)), "bOe": n(ks[7], (D,)),
        "Wf1h": n(ks[8], (D, 2 * D)), "bf1h": n(ks[9], (2 * D,)),
        "Wf2h": n(ks[10], (2 * D, D)), "bf2h": n(ks[11], (D,)),
        "Wf1e": n(ks[12], (D, 2 * D)), "bf1e": n(ks[13], (2 * D,)),
        "Wf2e": n(ks[14], (2 * D, D)), "bf2e": n(ks[15], (D,)),
        "g1h": 1.0 + n(ks[16], (D,)), "b1h": n(ks[17], (D,)),
        "g1e": 1.0 + n(ks[18], (D,)), "b1e": n(ks[19], (D,)),
        "g2h": 1.0 + n(ks[20], (D,)), "b2h": n(ks[21], (D,)),
        "g2e": 1.0 + n(ks[22], (D,)), "b2e": n(ks[23], (D,)),
    }


if __name__ == "__main__":
    B, L, D, H = 2, 8, 32, 4   # batch, num_nodes, hidden dim, heads (C = 8)

    key = jax.random.PRNGKey(0)
    kh, ke, kp = jax.random.split(key, 3)
    h = jax.random.normal(kh, (B, L, D), dtype=jnp.float32)
    e = jax.random.normal(ke, (B, L, L, D), dtype=jnp.float32)
    params = prepare_params(make_params(kp, D))

    h_out, e_out = graph_transformer_layer(h, e, params, num_heads=H)
    h_out = jax.block_until_ready(h_out)
    e_out = jax.block_until_ready(e_out)

    h_ref, e_ref = ref_forward(h, e, params, num_heads=H)
    h_ref = jax.block_until_ready(h_ref)
    e_ref = jax.block_until_ready(e_ref)

    dh = float(jnp.max(jnp.abs(h_out - h_ref)))
    de = float(jnp.max(jnp.abs(e_out - e_ref)))
    # bf16 MXU operands + bf16-streamed e intermediates (f32 accumulation and
    # f32 BN/softmax math) vs the f32-HIGHEST reference: loose abs tolerance
    # on the BN-normalized outputs.
    assert dh < 1e-1 and de < 1e-1, f"mismatch: dh={dh}, de={de}"

    print("KERNEL_OK")
</pallas_src>

<mosaic_0001>
module attributes {stable_mosaic.version = 11 : i64} {
  func.func @_qkv_kernel(%arg0: i32, %arg1: memref<16x32xf32, #tpu.memory_space<vmem>>, %arg2: memref<32x96xbf16, #tpu.memory_space<vmem>>, %arg3: memref<16x96xf32, #tpu.memory_space<vmem>>) attributes {dimension_semantics = [#tpu.dimension_semantics<parallel>], iteration_bounds = array<i64: 1>, scalar_prefetch = 0 : i64, scratch_operands = 0 : i64, tpu.core_type = #tpu.core_type<tc>, window_params = [{transform_indices = @transform_0, window_bounds = array<i64: 16, 32>}, {pipeline_mode = #tpu.pipeline_mode<synchronous>, transform_indices = @transform_1, window_bounds = array<i64: 32, 96>}, {transform_indices = @transform_2, window_bounds = array<i64: 16, 96>}]} {
    %c0 = arith.constant 0 : index
    %c0_0 = arith.constant 0 : index
    %0 = vector.load %arg1[%c0, %c0_0] : memref<16x32xf32, #tpu.memory_space<vmem>>, vector<16x32xf32>
    %1 = arith.truncf %0 : vector<16x32xf32> to vector<16x32xbf16>
    %c0_1 = arith.constant 0 : index
    %c0_2 = arith.constant 0 : index
    %2 = vector.load %arg2[%c0_1, %c0_2] : memref<32x96xbf16, #tpu.memory_space<vmem>>, vector<32x96xbf16>
    %cst = arith.constant dense<0.000000e+00> : vector<16x96xf32>
    %3 = tpu.matmul %1, %2, %cst {dimension_numbers = #tpu.dot_dimension_numbers<[1], [0], [0], [1], [0, 0, 1, 1], [], []>} : vector<16x32xbf16>, vector<32x96xbf16>, vector<16x96xf32> -> vector<16x96xf32>
    %c0_3 = arith.constant 0 : index
    %c0_4 = arith.constant 0 : index
    %4 = vector.load %arg3[%c0_3, %c0_4] : memref<16x96xf32, #tpu.memory_space<vmem>>, vector<16x96xf32>
    tpu.vector_store %arg3[%c0_3, %c0_4], %3 {strides = array<i32>} : memref<16x96xf32, #tpu.memory_space<vmem>>, vector<16x96xf32>,
    return
  }
  func.func @transform_0(%arg0: i32) -> (i32, i32) {
    %c0_i32 = arith.constant 0 : i32
    %c0_i32_0 = arith.constant 0 : i32
    return %arg0, %c0_i32 : i32, i32
  }
  func.func @transform_1(%arg0: i32) -> (i32, i32) {
    %c0_i32 = arith.constant 0 : i32
    %c0_i32_0 = arith.constant 0 : i32
    %c0_i32_1 = arith.constant 0 : i32
    return %c0_i32, %c0_i32_0 : i32, i32
  }
  func.func @transform_2(%arg0: i32) -> (i32, i32) {
    %c0_i32 = arith.constant 0 : i32
    %c0_i32_0 = arith.constant 0 : i32
    return %arg0, %c0_i32 : i32, i32
  }
}

</mosaic_0001>

<bundles_post_ra>
// kernel: tpu_custom_call.1
= control target key start
LH: loop header
LB: loop body
LE: loop exit
PB: predicated region body
PF: predicated region fallthrough
CT: control target
= control target key end

     0   :  { %7 = vsyncpa [#allocation3], 0  ;;  %s289_s0 = inlined_call_operand.hbm [shape: f32[16,32], index: 0, kind: input, shape index: {}]   ;;  %s290_s1 = inlined_call_operand.hbm [shape: bf16[32,96], index: 1, kind: input, shape index: {}]   ;;  %s291_s2 = inlined_call_operand.hbm [shape: f32[16,96], index: 2, kind: output, shape index: {}]  }
   0x1   :  { %8 = vsyncpa [#allocation6], 0 }
   0x2   :  { %9 = vsyncpa [#allocation4], 0  ;;  %s223_s9 = smov [#allocation2]   ;;  %s151_s13 = scalar_lea.hbm %s289_s0, 256 }
   0x3   :  { %s15_s10 = sshll.u32 %s223_s9, 4  ;;  %p152_p0 = scmp.ne.s32.totalorder %s289_s0, %s151_s13  ;;  %s16_s10 = int_to_ptr.vmem [resolvable:$true] %s15_s10 }
   0x4   :  { %p155_p1 = scmp.lt.u32.totalorder %s151_s13, %s289_s0 }
   0x6   :  { %p157_p2 = pnand %p155_p1, %p152_p0 }
   0x8   :  { %160 = shalt.err (!%p157_p2)
}
   0x9   :  { %s161_s18 = scalar_lea.vmem %s16_s10, 256  ;;  %p166_p4 = scmp.lt.s32.totalorder %s16_s10, %s16_s10 }
   0xa   :  { %p162_p3 = scmp.ne.s32.totalorder %s16_s10, %s161_s18  ;;  %p167_p5 = scmp.lt.s32.totalorder %s161_s18, %s161_s18 }
   0xc   :  { %p168_p6 = por %p167_p5, %p166_p4 }
   0xe   :  { %p169_p7 = pnand %p168_p6, %p162_p3 }
  0x10   :  { %172 = shalt.err (!%p169_p7)
}
  0x11   :  { %s224_s19 = smov 128   ;;  %s225_s20 = smov 8  }
  0x12   :  { %21 = dma.hbm_to_vmem [thread:$0]  %s289_s0, 256, %s16_s10, [#allocation3], %s224_s19, %s224_s19, %s225_s20  }
  0x13   :  { %s226_s23 = smov [#allocation5]   ;;  %s173_s27 = scalar_lea.hbm %s290_s1, 256 }
  0x14   :  { %s27_s24 = sshll.u32 %s226_s23, 4  ;;  %p174_p8 = scmp.ne.s32.totalorder %s290_s1, %s173_s27  ;;  %s28_s24 = int_to_ptr.vmem [resolvable:$true] %s27_s24 }
  0x15   :  { %p177_p9 = scmp.lt.u32.totalorder %s173_s27, %s290_s1 }
  0x17   :  { %p179_p10 = pnand %p177_p9, %p174_p8 }
  0x19   :  { %182 = shalt.err (!%p179_p10)
}
  0x1a   :  { %s183_s4 = scalar_lea.vmem %s28_s24, 256  ;;  %p188_p12 = scmp.lt.s32.totalorder %s28_s24, %s28_s24 }
  0x1b   :  { %p184_p11 = scmp.ne.s32.totalorder %s28_s24, %s183_s4  ;;  %p189_p13 = scmp.lt.s32.totalorder %s183_s4, %s183_s4 }
  0x1d   :  { %p190_p0 = por %p189_p13, %p188_p12 }
  0x1f   :  { %p191_p1 = pnand %p190_p0, %p184_p11 }
  0x21   :  { %194 = shalt.err (!%p191_p1)
}
  0x22   :  { %s227_s0 = smov 64   ;;  %s228_s5 = smov 4  }
  0x23   :  { %33 = dma.hbm_to_vmem [thread:$0]  %s290_s1, 256, %s28_s24, [#allocation6], %s227_s0, %s227_s0, %s228_s5  }
  0x24   :  { %217 = dma.done.wait [#allocation3], 256  }
  0x25   :  { %218 = vsyncadd [#allocation3], 4294967040 }
  0x26   :  { %219 = dma.done.wait [#allocation6], 256  }
  0x27   :  { %220 = vsyncadd [#allocation6], 4294967040  ;;  %v229_v0 = vmov 0.0   ;;  %vm230_vm0 = vmmov 0   ;;  %v149_v1 = vld [vmem:[#allocation5] sm:$0xff]   ;;  %v150_v2 = vld [vmem:[#allocation5 + $0x8] sm:$0xff]  }
  0x28   :  { %132 = vmatprep.subr.bf16.mxu0 %v229_v0  ;;  %136 = vmatprep.mubr.msk.bf16.mxu0 %vm230_vm0, %v229_v0  ;;  %v41_v3 = vld [vmem:[#allocation2] sm:$0xff]  ;;  %v42_v4 = vld [vmem:[#allocation2 + $0x8] sm:$0xff]  ;;  %vm60_vm1 = vcmask 261120   ;;  %vm105_vm2 = vcmask 785408   ;;  %s231_s1 = smov [#allocation7]  }
  0x29   :  { %133 = vmatpush3.bf16.msra.mxu0 %v149_v1  ;;  %v43_v5 = vpack.c.bf16 %v42_v4, %v41_v3  ;;  %s113_s8 = sshll.u32 %s231_s1, 4  ;;  %s114_s8 = int_to_ptr.vmem [resolvable:$true] %s113_s8 }
  0x2a   :  { %134 = vmatprep.subr.bf16.mxu0 %v229_v0  ;;  %s195_s9 = scalar_lea.vmem %s114_s8, 256  ;;  %p200_p3 = scmp.lt.s32.totalorder %s114_s8, %s114_s8 }
  0x2b   :  { %p196_p2 = scmp.ne.s32.totalorder %s114_s8, %s195_s9  ;;  %p201_p4 = scmp.lt.s32.totalorder %s195_s9, %s195_s9 }
  0x2d   :  { %135 = vmatpush3.bf16.msra.mxu0 %v150_v2  ;;  %p202_p5 = por %p201_p4, %p200_p3 }
  0x2f   :  { %p203_p6 = pnand %p202_p5, %p196_p2 }
  0x30   :  { %137 = vmatmul.mubr.msk.bf16.vlgmr.msra.gmra.mrb[0].mxu0 %vm60_vm1, %v43_v5 }
 0x103   :  { %v98_v6 = vpop.f32.mrb[0].mxu0 }
 0x104   :  { %106 = vst.msk [vmem:[#allocation7] sm:$0xff] %vm105_vm2, %v98_v6  ;;  %v138_v7 = vpop.f32.mrb[1].mxu0 }
 0x105   :  { %v101_v8 = vpop.f32.mrb[2].mxu0 }
 0x106   :  { %107 = vst.msk [vmem:[#allocation7 + $0x8] sm:$0xff] %vm105_vm2, %v101_v8  ;;  %v139_v9 = vpop.f32.mrb[3].mxu0 }
 0x107   :  { %206 = shalt.err (!%p203_p6)
}
 0x108   :  { %s207_s12 = scalar_lea.hbm %s291_s2, 256 }
 0x109   :  { %p208_p7 = scmp.ne.s32.totalorder %s291_s2, %s207_s12  ;;  %p211_p8 = scmp.lt.u32.totalorder %s207_s12, %s291_s2 }
 0x10b   :  { %p213_p9 = pnand %p211_p8, %p208_p7 }
 0x10d   :  { %216 = shalt.err (!%p213_p9)
}
 0x10e   :  { %119 = dma.vmem_to_hbm [thread:$0]  %s114_s8, 256, %s291_s2, [#allocation4], %s224_s19, %s224_s19, %s225_s20  }
 0x10f   :  { %221 = dma.done.wait [#allocation4], 256  }
 0x110   :  { %222 = vsyncadd [#allocation4], 4294967040 }
 0x111   :  { %123 = vsyncpa [#allocation3], 1 }
 0x112   :  { %124 = vsyncpa [#allocation6], 1 }
 0x113   :  { %125 = vsyncpa [#allocation4], 1 }

</bundles_post_ra>
